<compile_context>
chip_gen: v6e
topology: v6e:2x2x1
jax: 0.10.0
libtpu: 0.0.40
codegen_flags: <defaults>
</compile_context>

<pallas_src>
import functools

import jax
import jax.numpy as jnp
import numpy as np
from jax.experimental import pallas as pl
from jax.experimental.pallas import tpu as pltpu


def _fused_conv3x3_kernel(x_ref, m_ref, w1_ref, b1_ref, w2_ref, b2_ref,
                          o_ref, col1_ref, col2_ref, *, W):
    """Fused (conv3x3 + ReLU) x 2 for one image, channels-first, flat spatial.

    x_ref:   (1, Cin, HW)    input image, HW = H*W flattened into the lane dim
    m_ref:   (9, HW)         per-tap validity masks (1.0 inside, 0.0 = zero pad)
    w1_ref:  (Cout, 9*Cin)   conv1 weight, tap-major then input-channel
    b1_ref:  (Cout, 1)
    w2_ref:  (Cout, 9*Cout)  conv2 weight
    b2_ref:  (Cout, 1)
    o_ref:   (1, Cout, HW)   output image
    col1_ref:(9*Cin, HW)     VMEM im2col scratch for conv1
    col2_ref:(9*Cout, HW)    VMEM im2col scratch for conv2
    """
    HW = x_ref.shape[2]
    masks = m_ref[...]                                   # (9, HW), loaded once

    def im2col(a, col_ref):
        # a: (C, HW).  col[k*C + c, p] = a[c, p + dy*W + dx], 0 outside image.
        C = a.shape[0]
        for k in range(9):
            dy, dx = k // 3 - 1, k % 3 - 1
            s = dy * W + dx                              # flat spatial offset
            shifted = a if s == 0 else pltpu.roll(a, shift=(-s) % HW, axis=1)
            col_ref[k * C:(k + 1) * C, :] = shifted * masks[k:k + 1, :]
        return col_ref[...]

    x = x_ref[0].astype(jnp.float32)                     # (Cin, HW)

    # conv1 + ReLU: one MXU matmul, K = 9*Cin, lane dim (N) = HW.
    col1 = im2col(x, col1_ref)                           # (9*Cin, HW)
    y1 = jnp.dot(w1_ref[...], col1, preferred_element_type=jnp.float32)
    y1 = jnp.maximum(y1 + b1_ref[...], 0.0)              # (Cout, HW) in VMEM

    # conv2 + ReLU on the VMEM-resident intermediate (no HBM round-trip).
    col2 = im2col(y1, col2_ref)                          # (9*Cout, HW)
    y2 = jnp.dot(w2_ref[...], col2, preferred_element_type=jnp.float32)
    y2 = jnp.maximum(y2 + b2_ref[...], 0.0)

    o_ref[...] = y2[None].astype(o_ref.dtype)


def _tap_masks(H, W):
    """(9, H*W) float32 masks: 1.0 where tap (dy,dx) reads inside the image."""
    yy, xx = np.meshgrid(np.arange(H), np.arange(W), indexing="ij")
    yy = yy.reshape(-1)
    xx = xx.reshape(-1)
    masks = np.zeros((9, H * W), dtype=np.float32)
    for k in range(9):
        dy, dx = k // 3 - 1, k % 3 - 1
        valid = ((yy + dy >= 0) & (yy + dy < H) &
                 (xx + dx >= 0) & (xx + dx < W))
        masks[k] = valid.astype(np.float32)
    return jnp.asarray(masks)


def _flatten_conv_weight(w_oihw):
    """(O, I, 3, 3) -> (O, 9*I), ordered tap-major (k = ky*3+kx) then channel,
    matching the im2col row order k*C + c."""
    O, I = w_oihw.shape[0], w_oihw.shape[1]
    return jnp.transpose(w_oihw, (0, 2, 3, 1)).reshape(O, 9 * I)


@jax.jit
def conv3x3_forward(x_nchw, w1_oihw, b1, w2_oihw, b2):
    """Conv3x3.forward: (conv3x3+ReLU) twice, fused in one kernel. NCHW in/out."""
    N, Cin, H, W = x_nchw.shape
    Cout = w1_oihw.shape[0]
    HW = H * W

    x_flat = x_nchw.reshape(N, Cin, HW)            # contiguous -> free reshape
    masks = _tap_masks(H, W)                       # compile-time constant
    w1f = _flatten_conv_weight(w1_oihw)            # (Cout, 9*Cin)
    w2f = _flatten_conv_weight(w2_oihw)            # (Cout, 9*Cout)
    b1c = b1.reshape(Cout, 1)
    b2c = b2.reshape(Cout, 1)

    kernel = functools.partial(_fused_conv3x3_kernel, W=W)

    out_flat = pl.pallas_call(
        kernel,
        out_shape=jax.ShapeDtypeStruct((N, Cout, HW), x_nchw.dtype),
        grid=(N,),
        in_specs=[
            pl.BlockSpec((1, Cin, HW), lambda n: (n, 0, 0)),
            pl.BlockSpec((9, HW), lambda n: (0, 0)),
            pl.BlockSpec((Cout, 9 * Cin), lambda n: (0, 0)),
            pl.BlockSpec((Cout, 1), lambda n: (0, 0)),
            pl.BlockSpec((Cout, 9 * Cout), lambda n: (0, 0)),
            pl.BlockSpec((Cout, 1), lambda n: (0, 0)),
        ],
        out_specs=pl.BlockSpec((1, Cout, HW), lambda n: (n, 0, 0)),
        scratch_shapes=[
            pltpu.VMEM((9 * Cin, HW), jnp.float32),
            pltpu.VMEM((9 * Cout, HW), jnp.float32),
        ],
        compiler_params=pltpu.CompilerParams(
            dimension_semantics=("parallel",),
            # above the 32 MiB scoped default, safely below v7x's 64 MiB/core
            vmem_limit_bytes=48 * 1024 * 1024,
        ),
    )(x_flat, masks, w1f, b1c, w2f, b2c)

    return out_flat.reshape(N, Cout, H, W)


def _spectral_normalize(w_oihw):
    """Divide weight by its largest singular value of weight.view(out, -1)."""
    cout = w_oihw.shape[0]
    sigma = jnp.linalg.svd(w_oihw.reshape(cout, -1), compute_uv=False)[0]
    return w_oihw / sigma


def make_conv3x3_params(key, in_feat, out_feat, dtype=jnp.float32):
    """Deterministic parameters mirroring Conv3x3.__init__ shapes (OIHW)."""
    k1, k2, k3, k4 = jax.random.split(key, 4)
    w1 = jax.random.normal(k1, (out_feat, in_feat, 3, 3), dtype) * 0.1
    b1 = jax.random.normal(k2, (out_feat,), dtype) * 0.1
    w2 = jax.random.normal(k3, (out_feat, out_feat, 3, 3), dtype) * 0.1
    b2 = jax.random.normal(k4, (out_feat,), dtype) * 0.1
    w1 = _spectral_normalize(w1)
    w2 = _spectral_normalize(w2)
    return (w1, b1), (w2, b2)


def _reference_forward(x_nchw, w1_oihw, b1, w2_oihw, b2):
    """Pure-JAX reference (lax conv, NCHW/OIHW) for correctness cross-check."""
    def conv(x, w, b):
        y = jax.lax.conv_general_dilated(
            x, w, window_strides=(1, 1), padding=((1, 1), (1, 1)),
            dimension_numbers=("NCHW", "OIHW", "NCHW"))
        return jax.nn.relu(y + b[None, :, None, None])
    return conv(conv(x_nchw, w1_oihw, b1), w2_oihw, b2)


if __name__ == "__main__":
    key = jax.random.PRNGKey(0)
    k_x, k_p = jax.random.split(key)

    N, C_in, C_out, H, W = 2, 4, 8, 16, 16
    x = jax.random.normal(k_x, (N, C_in, H, W), jnp.float32)

    (w1, b1), (w2, b2) = make_conv3x3_params(k_p, C_in, C_out)

    out = conv3x3_forward(x, w1, b1, w2, b2)
    out = jax.block_until_ready(out)

    ref = _reference_forward(x, w1, b1, w2, b2)
    assert out.shape == (N, C_out, H, W)
    assert jnp.allclose(out, ref, atol=1e-4, rtol=1e-4), \
        float(jnp.max(jnp.abs(out - ref)))

    print("KERNEL_OK")
</pallas_src>

<mosaic_0001>
module attributes {stable_mosaic.version = 11 : i64} {
  func.func @_fused_conv3x3_kernel(%arg0: i32, %arg1: memref<1x4x256xf32, #tpu.memory_space<vmem>>, %arg2: memref<9x256xf32, #tpu.memory_space<vmem>>, %arg3: memref<8x36xf32, #tpu.memory_space<vmem>>, %arg4: memref<8x1xf32, #tpu.memory_space<vmem>>, %arg5: memref<8x72xf32, #tpu.memory_space<vmem>>, %arg6: memref<8x1xf32, #tpu.memory_space<vmem>>, %arg7: memref<1x8x256xf32, #tpu.memory_space<vmem>>, %arg8: memref<36x256xf32, #tpu.memory_space<vmem>>, %arg9: memref<72x256xf32, #tpu.memory_space<vmem>>) attributes {dimension_semantics = [#tpu.dimension_semantics<parallel>], iteration_bounds = array<i64: 2>, scalar_prefetch = 0 : i64, scratch_operands = 2 : i64, tpu.core_type = #tpu.core_type<tc>, window_params = [{transform_indices = @transform_0, window_bounds = array<i64: 1, 4, 256>}, {pipeline_mode = #tpu.pipeline_mode<synchronous>, transform_indices = @transform_1, window_bounds = array<i64: 9, 256>}, {pipeline_mode = #tpu.pipeline_mode<synchronous>, transform_indices = @transform_2, window_bounds = array<i64: 8, 36>}, {pipeline_mode = #tpu.pipeline_mode<synchronous>, transform_indices = @transform_3, window_bounds = array<i64: 8, 1>}, {pipeline_mode = #tpu.pipeline_mode<synchronous>, transform_indices = @transform_4, window_bounds = array<i64: 8, 72>}, {pipeline_mode = #tpu.pipeline_mode<synchronous>, transform_indices = @transform_5, window_bounds = array<i64: 8, 1>}, {transform_indices = @transform_6, window_bounds = array<i64: 1, 8, 256>}]} {
    %c0 = arith.constant 0 : index
    %c0_0 = arith.constant 0 : index
    %0 = vector.load %arg2[%c0, %c0_0] : memref<9x256xf32, #tpu.memory_space<vmem>>, vector<9x256xf32>
    %c0_1 = arith.constant 0 : index
    %c0_2 = arith.constant 0 : index
    %c0_3 = arith.constant 0 : index
    %1 = vector.load %arg1[%c0_1, %c0_2, %c0_3] : memref<1x4x256xf32, #tpu.memory_space<vmem>>, vector<1x4x256xf32>
    %2 = vector.shape_cast %1 : vector<1x4x256xf32> to vector<4x256xf32>
    %c17_i32 = arith.constant 17 : i32
    %3 = tpu.dynamic_rotate %2 by %c17_i32 dim 1 : vector<4x256xf32>, i32 -> vector<4x256xf32>
    %4 = vector.extract_strided_slice %0 {offsets = [0, 0], sizes = [1, 256], strides = [1, 1]} : vector<9x256xf32> to vector<1x256xf32>
    %5 = vector.broadcast %4 : vector<1x256xf32> to vector<4x256xf32>
    %6 = arith.mulf %3, %5 : vector<4x256xf32>
    %c0_4 = arith.constant 0 : index
    %c0_5 = arith.constant 0 : index
    %7 = vector.load %arg8[%c0_4, %c0_5] : memref<36x256xf32, #tpu.memory_space<vmem>>, vector<4x256xf32>
    tpu.vector_store %arg8[%c0_4, %c0_5], %6 {strides = array<i32>} : memref<36x256xf32, #tpu.memory_space<vmem>>, vector<4x256xf32>,
    %c16_i32 = arith.constant 16 : i32
    %8 = tpu.dynamic_rotate %2 by %c16_i32 dim 1 : vector<4x256xf32>, i32 -> vector<4x256xf32>
    %9 = vector.extract_strided_slice %0 {offsets = [1, 0], sizes = [1, 256], strides = [1, 1]} : vector<9x256xf32> to vector<1x256xf32>
    %10 = vector.broadcast %9 : vector<1x256xf32> to vector<4x256xf32>
    %11 = arith.mulf %8, %10 : vector<4x256xf32>
    %c4 = arith.constant 4 : index
    %c0_6 = arith.constant 0 : index
    %12 = vector.load %arg8[%c4, %c0_6] : memref<36x256xf32, #tpu.memory_space<vmem>>, vector<4x256xf32>
    tpu.vector_store %arg8[%c4, %c0_6], %11 {strides = array<i32>} : memref<36x256xf32, #tpu.memory_space<vmem>>, vector<4x256xf32>,
    %c15_i32 = arith.constant 15 : i32
    %13 = tpu.dynamic_rotate %2 by %c15_i32 dim 1 : vector<4x256xf32>, i32 -> vector<4x256xf32>
    %14 = vector.extract_strided_slice %0 {offsets = [2, 0], sizes = [1, 256], strides = [1, 1]} : vector<9x256xf32> to vector<1x256xf32>
    %15 = vector.broadcast %14 : vector<1x256xf32> to vector<4x256xf32>
    %16 = arith.mulf %13, %15 : vector<4x256xf32>
    %c8 = arith.constant 8 : index
    %c0_7 = arith.constant 0 : index
    %17 = vector.load %arg8[%c8, %c0_7] : memref<36x256xf32, #tpu.memory_space<vmem>>, vector<4x256xf32>
    tpu.vector_store %arg8[%c8, %c0_7], %16 {strides = array<i32>} : memref<36x256xf32, #tpu.memory_space<vmem>>, vector<4x256xf32>,
    %c1_i32 = arith.constant 1 : i32
    %18 = tpu.dynamic_rotate %2 by %c1_i32 dim 1 : vector<4x256xf32>, i32 -> vector<4x256xf32>
    %19 = vector.extract_strided_slice %0 {offsets = [3, 0], sizes = [1, 256], strides = [1, 1]} : vector<9x256xf32> to vector<1x256xf32>
    %20 = vector.broadcast %19 : vector<1x256xf32> to vector<4x256xf32>
    %21 = arith.mulf %18, %20 : vector<4x256xf32>
    %c12 = arith.constant 12 : index
    %c0_8 = arith.constant 0 : index
    %22 = vector.load %arg8[%c12, %c0_8] : memref<36x256xf32, #tpu.memory_space<vmem>>, vector<4x256xf32>
    tpu.vector_store %arg8[%c12, %c0_8], %21 {strides = array<i32>} : memref<36x256xf32, #tpu.memory_space<vmem>>, vector<4x256xf32>,
    %23 = vector.extract_strided_slice %0 {offsets = [4, 0], sizes = [1, 256], strides = [1, 1]} : vector<9x256xf32> to vector<1x256xf32>
    %24 = vector.broadcast %23 : vector<1x256xf32> to vector<4x256xf32>
    %25 = arith.mulf %2, %24 : vector<4x256xf32>
    %c16 = arith.constant 16 : index
    %c0_9 = arith.constant 0 : index
    %26 = vector.load %arg8[%c16, %c0_9] : memref<36x256xf32, #tpu.memory_space<vmem>>, vector<4x256xf32>
    tpu.vector_store %arg8[%c16, %c0_9], %25 {strides = array<i32>} : memref<36x256xf32, #tpu.memory_space<vmem>>, vector<4x256xf32>,
    %c255_i32 = arith.constant 255 : i32
    %27 = tpu.dynamic_rotate %2 by %c255_i32 dim 1 : vector<4x256xf32>, i32 -> vector<4x256xf32>
    %28 = vector.extract_strided_slice %0 {offsets = [5, 0], sizes = [1, 256], strides = [1, 1]} : vector<9x256xf32> to vector<1x256xf32>
    %29 = vector.broadcast %28 : vector<1x256xf32> to vector<4x256xf32>
    %30 = arith.mulf %27, %29 : vector<4x256xf32>
    %c20 = arith.constant 20 : index
    %c0_10 = arith.constant 0 : index
    %31 = vector.load %arg8[%c20, %c0_10] : memref<36x256xf32, #tpu.memory_space<vmem>>, vector<4x256xf32>
    tpu.vector_store %arg8[%c20, %c0_10], %30 {strides = array<i32>} : memref<36x256xf32, #tpu.memory_space<vmem>>, vector<4x256xf32>,
    %c241_i32 = arith.constant 241 : i32
    %32 = tpu.dynamic_rotate %2 by %c241_i32 dim 1 : vector<4x256xf32>, i32 -> vector<4x256xf32>
    %33 = vector.extract_strided_slice %0 {offsets = [6, 0], sizes = [1, 256], strides = [1, 1]} : vector<9x256xf32> to vector<1x256xf32>
    %34 = vector.broadcast %33 : vector<1x256xf32> to vector<4x256xf32>
    %35 = arith.mulf %32, %34 : vector<4x256xf32>
    %c24 = arith.constant 24 : index
    %c0_11 = arith.constant 0 : index
    %36 = vector.load %arg8[%c24, %c0_11] : memref<36x256xf32, #tpu.memory_space<vmem>>, vector<4x256xf32>
    tpu.vector_store %arg8[%c24, %c0_11], %35 {strides = array<i32>} : memref<36x256xf32, #tpu.memory_space<vmem>>, vector<4x256xf32>,
    %c240_i32 = arith.constant 240 : i32
    %37 = tpu.dynamic_rotate %2 by %c240_i32 dim 1 : vector<4x256xf32>, i32 -> vector<4x256xf32>
    %38 = vector.extract_strided_slice %0 {offsets = [7, 0], sizes = [1, 256], strides = [1, 1]} : vector<9x256xf32> to vector<1x256xf32>
    %39 = vector.broadcast %38 : vector<1x256xf32> to vector<4x256xf32>
    %40 = arith.mulf %37, %39 : vector<4x256xf32>
    %c28 = arith.constant 28 : index
    %c0_12 = arith.constant 0 : index
    %41 = vector.load %arg8[%c28, %c0_12] : memref<36x256xf32, #tpu.memory_space<vmem>>, vector<4x256xf32>
    tpu.vector_store %arg8[%c28, %c0_12], %40 {strides = array<i32>} : memref<36x256xf32, #tpu.memory_space<vmem>>, vector<4x256xf32>,
    %c239_i32 = arith.constant 239 : i32
    %42 = tpu.dynamic_rotate %2 by %c239_i32 dim 1 : vector<4x256xf32>, i32 -> vector<4x256xf32>
    %43 = vector.extract_strided_slice %0 {offsets = [8, 0], sizes = [1, 256], strides = [1, 1]} : vector<9x256xf32> to vector<1x256xf32>
    %44 = vector.broadcast %43 : vector<1x256xf32> to vector<4x256xf32>
    %45 = arith.mulf %42, %44 : vector<4x256xf32>
    %c32 = arith.constant 32 : index
    %c0_13 = arith.constant 0 : index
    %46 = vector.load %arg8[%c32, %c0_13] : memref<36x256xf32, #tpu.memory_space<vmem>>, vector<4x256xf32>
    tpu.vector_store %arg8[%c32, %c0_13], %45 {strides = array<i32>} : memref<36x256xf32, #tpu.memory_space<vmem>>, vector<4x256xf32>,
    %c0_14 = arith.constant 0 : index
    %c0_15 = arith.constant 0 : index
    %47 = vector.load %arg8[%c0_14, %c0_15] : memref<36x256xf32, #tpu.memory_space<vmem>>, vector<36x256xf32>
    %c0_16 = arith.constant 0 : index
    %c0_17 = arith.constant 0 : index
    %48 = vector.load %arg3[%c0_16, %c0_17] : memref<8x36xf32, #tpu.memory_space<vmem>>, vector<8x36xf32>
    %cst = arith.constant dense<0.000000e+00> : vector<8x256xf32>
    %49 = tpu.matmul %48, %47, %cst {dimension_numbers = #tpu.dot_dimension_numbers<[1], [0], [0], [1], [0, 0, 1, 1], [], []>} : vector<8x36xf32>, vector<36x256xf32>, vector<8x256xf32> -> vector<8x256xf32>
    %c0_18 = arith.constant 0 : index
    %c0_19 = arith.constant 0 : index
    %50 = vector.load %arg4[%c0_18, %c0_19] : memref<8x1xf32, #tpu.memory_space<vmem>>, vector<8x1xf32>
    %51 = vector.broadcast %50 : vector<8x1xf32> to vector<8x256xf32>
    %52 = arith.addf %49, %51 : vector<8x256xf32>
    %cst_20 = arith.constant 0.000000e+00 : f32
    %53 = vector.broadcast %cst_20 : f32 to vector<8x256xf32>
    %54 = arith.maximumf %52, %53 : vector<8x256xf32>
    %c17_i32_21 = arith.constant 17 : i32
    %55 = tpu.dynamic_rotate %54 by %c17_i32_21 dim 1 : vector<8x256xf32>, i32 -> vector<8x256xf32>
    %56 = vector.extract_strided_slice %0 {offsets = [0, 0], sizes = [1, 256], strides = [1, 1]} : vector<9x256xf32> to vector<1x256xf32>
    %57 = vector.broadcast %56 : vector<1x256xf32> to vector<8x256xf32>
    %58 = arith.mulf %55, %57 : vector<8x256xf32>
    %c0_22 = arith.constant 0 : index
    %c0_23 = arith.constant 0 : index
    %59 = vector.load %arg9[%c0_22, %c0_23] : memref<72x256xf32, #tpu.memory_space<vmem>>, vector<8x256xf32>
    tpu.vector_store %arg9[%c0_22, %c0_23], %58 {strides = array<i32>} : memref<72x256xf32, #tpu.memory_space<vmem>>, vector<8x256xf32>,
    %c16_i32_24 = arith.constant 16 : i32
    %60 = tpu.dynamic_rotate %54 by %c16_i32_24 dim 1 : vector<8x256xf32>, i32 -> vector<8x256xf32>
    %61 = vector.extract_strided_slice %0 {offsets = [1, 0], sizes = [1, 256], strides = [1, 1]} : vector<9x256xf32> to vector<1x256xf32>
    %62 = vector.broadcast %61 : vector<1x256xf32> to vector<8x256xf32>
    %63 = arith.mulf %60, %62 : vector<8x256xf32>
    %c8_25 = arith.constant 8 : index
    %c0_26 = arith.constant 0 : index
    %64 = vector.load %arg9[%c8_25, %c0_26] : memref<72x256xf32, #tpu.memory_space<vmem>>, vector<8x256xf32>
    tpu.vector_store %arg9[%c8_25, %c0_26], %63 {strides = array<i32>} : memref<72x256xf32, #tpu.memory_space<vmem>>, vector<8x256xf32>,
    %c15_i32_27 = arith.constant 15 : i32
    %65 = tpu.dynamic_rotate %54 by %c15_i32_27 dim 1 : vector<8x256xf32>, i32 -> vector<8x256xf32>
    %66 = vector.extract_strided_slice %0 {offsets = [2, 0], sizes = [1, 256], strides = [1, 1]} : vector<9x256xf32> to vector<1x256xf32>
    %67 = vector.broadcast %66 : vector<1x256xf32> to vector<8x256xf32>
    %68 = arith.mulf %65, %67 : vector<8x256xf32>
    %c16_28 = arith.constant 16 : index
    %c0_29 = arith.constant 0 : index
    %69 = vector.load %arg9[%c16_28, %c0_29] : memref<72x256xf32, #tpu.memory_space<vmem>>, vector<8x256xf32>
    tpu.vector_store %arg9[%c16_28, %c0_29], %68 {strides = array<i32>} : memref<72x256xf32, #tpu.memory_space<vmem>>, vector<8x256xf32>,
    %c1_i32_30 = arith.constant 1 : i32
    %70 = tpu.dynamic_rotate %54 by %c1_i32_30 dim 1 : vector<8x256xf32>, i32 -> vector<8x256xf32>
    %71 = vector.extract_strided_slice %0 {offsets = [3, 0], sizes = [1, 256], strides = [1, 1]} : vector<9x256xf32> to vector<1x256xf32>
    %72 = vector.broadcast %71 : vector<1x256xf32> to vector<8x256xf32>
    %73 = arith.mulf %70, %72 : vector<8x256xf32>
    %c24_31 = arith.constant 24 : index
    %c0_32 = arith.constant 0 : index
    %74 = vector.load %arg9[%c24_31, %c0_32] : memref<72x256xf32, #tpu.memory_space<vmem>>, vector<8x256xf32>
    tpu.vector_store %arg9[%c24_31, %c0_32], %73 {strides = array<i32>} : memref<72x256xf32, #tpu.memory_space<vmem>>, vector<8x256xf32>,
    %75 = vector.extract_strided_slice %0 {offsets = [4, 0], sizes = [1, 256], strides = [1, 1]} : vector<9x256xf32> to vector<1x256xf32>
    %76 = vector.broadcast %75 : vector<1x256xf32> to vector<8x256xf32>
    %77 = arith.mulf %54, %76 : vector<8x256xf32>
    %c32_33 = arith.constant 32 : index
    %c0_34 = arith.constant 0 : index
    %78 = vector.load %arg9[%c32_33, %c0_34] : memref<72x256xf32, #tpu.memory_space<vmem>>, vector<8x256xf32>
    tpu.vector_store %arg9[%c32_33, %c0_34], %77 {strides = array<i32>} : memref<72x256xf32, #tpu.memory_space<vmem>>, vector<8x256xf32>,
    %c255_i32_35 = arith.constant 255 : i32
    %79 = tpu.dynamic_rotate %54 by %c255_i32_35 dim 1 : vector<8x256xf32>, i32 -> vector<8x256xf32>
    %80 = vector.extract_strided_slice %0 {offsets = [5, 0], sizes = [1, 256], strides = [1, 1]} : vector<9x256xf32> to vector<1x256xf32>
    %81 = vector.broadcast %80 : vector<1x256xf32> to vector<8x256xf32>
    %82 = arith.mulf %79, %81 : vector<8x256xf32>
    %c40 = arith.constant 40 : index
    %c0_36 = arith.constant 0 : index
    %83 = vector.load %arg9[%c40, %c0_36] : memref<72x256xf32, #tpu.memory_space<vmem>>, vector<8x256xf32>
    tpu.vector_store %arg9[%c40, %c0_36], %82 {strides = array<i32>} : memref<72x256xf32, #tpu.memory_space<vmem>>, vector<8x256xf32>,
    %c241_i32_37 = arith.constant 241 : i32
    %84 = tpu.dynamic_rotate %54 by %c241_i32_37 dim 1 : vector<8x256xf32>, i32 -> vector<8x256xf32>
    %85 = vector.extract_strided_slice %0 {offsets = [6, 0], sizes = [1, 256], strides = [1, 1]} : vector<9x256xf32> to vector<1x256xf32>
    %86 = vector.broadcast %85 : vector<1x256xf32> to vector<8x256xf32>
    %87 = arith.mulf %84, %86 : vector<8x256xf32>
    %c48 = arith.constant 48 : index
    %c0_38 = arith.constant 0 : index
    %88 = vector.load %arg9[%c48, %c0_38] : memref<72x256xf32, #tpu.memory_space<vmem>>, vector<8x256xf32>
    tpu.vector_store %arg9[%c48, %c0_38], %87 {strides = array<i32>} : memref<72x256xf32, #tpu.memory_space<vmem>>, vector<8x256xf32>,
    %c240_i32_39 = arith.constant 240 : i32
    %89 = tpu.dynamic_rotate %54 by %c240_i32_39 dim 1 : vector<8x256xf32>, i32 -> vector<8x256xf32>
    %90 = vector.extract_strided_slice %0 {offsets = [7, 0], sizes = [1, 256], strides = [1, 1]} : vector<9x256xf32> to vector<1x256xf32>
    %91 = vector.broadcast %90 : vector<1x256xf32> to vector<8x256xf32>
    %92 = arith.mulf %89, %91 : vector<8x256xf32>
    %c56 = arith.constant 56 : index
    %c0_40 = arith.constant 0 : index
    %93 = vector.load %arg9[%c56, %c0_40] : memref<72x256xf32, #tpu.memory_space<vmem>>, vector<8x256xf32>
    tpu.vector_store %arg9[%c56, %c0_40], %92 {strides = array<i32>} : memref<72x256xf32, #tpu.memory_space<vmem>>, vector<8x256xf32>,
    %c239_i32_41 = arith.constant 239 : i32
    %94 = tpu.dynamic_rotate %54 by %c239_i32_41 dim 1 : vector<8x256xf32>, i32 -> vector<8x256xf32>
    %95 = vector.extract_strided_slice %0 {offsets = [8, 0], sizes = [1, 256], strides = [1, 1]} : vector<9x256xf32> to vector<1x256xf32>
    %96 = vector.broadcast %95 : vector<1x256xf32> to vector<8x256xf32>
    %97 = arith.mulf %94, %96 : vector<8x256xf32>
    %c64 = arith.constant 64 : index
    %c0_42 = arith.constant 0 : index
    %98 = vector.load %arg9[%c64, %c0_42] : memref<72x256xf32, #tpu.memory_space<vmem>>, vector<8x256xf32>
    tpu.vector_store %arg9[%c64, %c0_42], %97 {strides = array<i32>} : memref<72x256xf32, #tpu.memory_space<vmem>>, vector<8x256xf32>,
    %c0_43 = arith.constant 0 : index
    %c0_44 = arith.constant 0 : index
    %99 = vector.load %arg9[%c0_43, %c0_44] : memref<72x256xf32, #tpu.memory_space<vmem>>, vector<72x256xf32>
    %c0_45 = arith.constant 0 : index
    %c0_46 = arith.constant 0 : index
    %100 = vector.load %arg5[%c0_45, %c0_46] : memref<8x72xf32, #tpu.memory_space<vmem>>, vector<8x72xf32>
    %cst_47 = arith.constant dense<0.000000e+00> : vector<8x256xf32>
    %101 = tpu.matmul %100, %99, %cst_47 {dimension_numbers = #tpu.dot_dimension_numbers<[1], [0], [0], [1], [0, 0, 1, 1], [], []>} : vector<8x72xf32>, vector<72x256xf32>, vector<8x256xf32> -> vector<8x256xf32>
    %c0_48 = arith.constant 0 : index
    %c0_49 = arith.constant 0 : index
    %102 = vector.load %arg6[%c0_48, %c0_49] : memref<8x1xf32, #tpu.memory_space<vmem>>, vector<8x1xf32>
    %103 = vector.broadcast %102 : vector<8x1xf32> to vector<8x256xf32>
    %104 = arith.addf %101, %103 : vector<8x256xf32>
    %cst_50 = arith.constant 0.000000e+00 : f32
    %105 = vector.broadcast %cst_50 : f32 to vector<8x256xf32>
    %106 = arith.maximumf %104, %105 : vector<8x256xf32>
    %107 = vector.shape_cast %106 : vector<8x256xf32> to vector<1x8x256xf32>
    %c0_51 = arith.constant 0 : index
    %c0_52 = arith.constant 0 : index
    %c0_53 = arith.constant 0 : index
    %108 = vector.load %arg7[%c0_51, %c0_52, %c0_53] : memref<1x8x256xf32, #tpu.memory_space<vmem>>, vector<1x8x256xf32>
    tpu.vector_store %arg7[%c0_51, %c0_52, %c0_53], %107 {strides = array<i32>} : memref<1x8x256xf32, #tpu.memory_space<vmem>>, vector<1x8x256xf32>,
    return
  }
  func.func @transform_0(%arg0: i32) -> (i32, i32, i32) {
    %c0_i32 = arith.constant 0 : i32
    %c0_i32_0 = arith.constant 0 : i32
    %c0_i32_1 = arith.constant 0 : i32
    return %arg0, %c0_i32, %c0_i32_0 : i32, i32, i32
  }
  func.func @transform_1(%arg0: i32) -> (i32, i32) {
    %c0_i32 = arith.constant 0 : i32
    %c0_i32_0 = arith.constant 0 : i32
    %c0_i32_1 = arith.constant 0 : i32
    return %c0_i32, %c0_i32_0 : i32, i32
  }
  func.func @transform_2(%arg0: i32) -> (i32, i32) {
    %c0_i32 = arith.constant 0 : i32
    %c0_i32_0 = arith.constant 0 : i32
    %c0_i32_1 = arith.constant 0 : i32
    return %c0_i32, %c0_i32_0 : i32, i32
  }
  func.func @transform_3(%arg0: i32) -> (i32, i32) {
    %c0_i32 = arith.constant 0 : i32
    %c0_i32_0 = arith.constant 0 : i32
    %c0_i32_1 = arith.constant 0 : i32
    return %c0_i32, %c0_i32_0 : i32, i32
  }
  func.func @transform_4(%arg0: i32) -> (i32, i32) {
    %c0_i32 = arith.constant 0 : i32
    %c0_i32_0 = arith.constant 0 : i32
    %c0_i32_1 = arith.constant 0 : i32
    return %c0_i32, %c0_i32_0 : i32, i32
  }
  func.func @transform_5(%arg0: i32) -> (i32, i32) {
    %c0_i32 = arith.constant 0 : i32
    %c0_i32_0 = arith.constant 0 : i32
    %c0_i32_1 = arith.constant 0 : i32
    return %c0_i32, %c0_i32_0 : i32, i32
  }
  func.func @transform_6(%arg0: i32) -> (i32, i32, i32) {
    %c0_i32 = arith.constant 0 : i32
    %c0_i32_0 = arith.constant 0 : i32
    %c0_i32_1 = arith.constant 0 : i32
    return %arg0, %c0_i32, %c0_i32_0 : i32, i32, i32
  }
}

</mosaic_0001>

<bundles_post_ra>
// kernel: conv3x3_forward.1
= control target key start
LH: loop header
LB: loop body
LE: loop exit
PB: predicated region body
PF: predicated region fallthrough
CT: control target
= control target key end

     0   :  { %s892_s21 = smov 0   ;;  %s1119_s0 = inlined_call_operand.vmem [shape: f32[2,4,256], index: 0, kind: input, shape index: {}]   ;;  %s1120_s1 = inlined_call_operand.vmem [shape: f32[9,256], index: 1, kind: input, shape index: {}]   ;;  %s1121_s2 = inlined_call_operand.vmem [shape: f32[8,36], index: 2, kind: input, shape index: {}]   ;;  %s1122_s3 = inlined_call_operand.vmem [shape: f32[8,1], index: 3, kind: input, shape index: {}]   ;;  %s1123_s4 = inlined_call_operand.vmem [shape: f32[8,72], index: 4, kind: input, shape index: {}]   ;;  %s1124_s5 = inlined_call_operand.vmem [shape: f32[8,1], index: 5, kind: input, shape index: {}]   ;;  %s1125_s6 = inlined_call_operand.vmem [shape: f32[2,8,256], index: 6, kind: output, shape index: {}]  }
   0x1 LB: > { %s800_s22 = sadd.s32 4294967295, %s845_s21   ;;  %p804_p0 = scmp.ge.s32.totalorder %s845_s21, 1  ;;  %s845_s21 = sphi %s892_s21, %s16_s21  }
   0x2   : > { %p212_p1 = scmp.lt.s32.totalorder %s845_s21, 3 }
   0x4   : > { %p213_p2 = pnand %p804_p0, %p212_p1 }
   0x5   : > { %p242_p3 = scmp.lt.s32.totalorder (!%p213_p2), %s800_s22, 1  ;;  %s847_s7 = smov (!%p213_p2), 111  }
   0x6   : > { %216 = sbr.rel (%p213_p2) target bundleno = 720 (0x2d0), region = 44  ;;  %s848_s8 = smov (!%p213_p2), 112  }
   0x7   : > { %s849_s9 = smov (!%p213_p2), 127   ;;  %s850_s10 = smov (!%p213_p2), 113  }
   0x8   : > { %s851_s11 = smov (!%p213_p2), 1   ;;  %s852_s12 = smov (!%p213_p2), 16  }
   0x9   : > { %s853_s13 = smov (!%p213_p2), 15   ;;  %s855_s14 = smov (!%p213_p2), 17  }
   0xb   : > { %v264_v0 = vlaneseq  ;;  %s1127_s22 = smov (!%p242_p3, %s800_s22), 1  ;;  %v252_v2 = vld [vmem:[%s1120_s1] sm:$0xff]  ;;  %v253_v3 = vld [vmem:[%s1120_s1 + $0x8] sm:$0xff]  ;;  %v854_v33 = vmov 0.0   ;;  %v856_v34 = vmov 0   ;;  %vm477_vm4 = vcmask 1043456  }
   0xc   : > { %s817_s27 = sshll.u32 %s1127_s22, 3  ;;  %548 = vmatprep.mubr.f32.mxu0 %v854_v33  ;;  %734 = vmatprep.mubr.f32.mxu1 %v854_v33  ;;  %v467_v35 = vld [vmem:[%s1122_s3] sm:$0xff]  ;;  %v973_v39 = vld [vmem:[%s1120_s1 + $0x10] ss:$0 sm:$0xff]  ;;  %v978_v40 = vld [vmem:[%s1120_s1 + $0x18] ss:$0 sm:$0xff] }
   0xd   : > { %v270_v1 = vshrl.u32 %v264_v0, 7  ;;  %s246_s30 = scalar_lea.vmem %s1119_s0, %s817_s27  ;;  %837 = vset.pattern.permute.xlu0 %v856_v34  ;;  %v967_v36 = vand.u32 127, %v264_v0  ;;  %vm473_vm9 = vcmask 293888   ;;  %vm666_vm10 = vcmask 588800   ;;  %s818_s29 = sshll.u32 %s1127_s22, 4 }
   0xe   : > { %v256_v8 = vld [vmem:[%s246_s30] sm:$0xff] }
   0xf   : > { %v352_v4 = vsub.s32 4, %v270_v1  ;;  %v377_v5 = vsub.s32 5, %v270_v1  ;;  %v421_v6 = vsub.s32 7, %v270_v1  ;;  %v402_v7 = vsub.s32 6, %v270_v1  ;;  %437 = vrot.lane.b32.xlu1 %v256_v8, %s847_s7  ;;  %412 = vrot.lane.b32.xlu0 %v256_v8, %s848_s8 }
  0x10   : > { %v258_v13 = vcombine.high %v256_v8, %v256_v8  ;;  %v334_v16 = vsub.s32 3, %v270_v1  ;;  %v290_v23 = vsub.s32 1, %v270_v1  ;;  %v315_v27 = vsub.s32 2, %v270_v1 }
  0x11   : > { %v913_v9 = vrot.slane %v252_v2, %v352_v4  ;;  %v915_v10 = vrot.slane %v253_v3, %v352_v4  ;;  %v917_v11 = vrot.slane %v252_v2, %v377_v5  ;;  %v919_v12 = vrot.slane %v253_v3, %v377_v5 }
  0x12   : > { %v923_v14 = vrot.slane %v252_v2, %v421_v6  ;;  %v925_v15 = vrot.slane %v253_v3, %v421_v6  ;;  %v927_v17 = vrot.slane %v252_v2, %v402_v7  ;;  %v929_v18 = vrot.slane %v253_v3, %v402_v7 }
  0x13   : > { %v360_v19 = vcombine.low %v913_v9, %v915_v10  ;;  %v933_v20 = vrot.slane %v252_v2, %v334_v16  ;;  %v935_v21 = vrot.slane %v253_v3, %v334_v16  ;;  %368 = vrot.lane.b32.xlu0 %v256_v8, %s849_s9  ;;  %439 = vrot.lane.b32.xlu1 %v258_v13, %s847_s7  ;;  %v271_v30 = vsub.s32 0, %v270_v1 }
  0x14   : > { %v939_v25 = vrot.slane %v252_v2, %v290_v23  ;;  %v941_v26 = vrot.slane %v253_v3, %v290_v23  ;;  %v945_v28 = vrot.slane %v252_v2, %v315_v27  ;;  %v947_v29 = vrot.slane %v253_v3, %v315_v27 }
  0x15   : > { %v362_v22 = vmul.f32 %v360_v19, %v256_v8  ;;  %v951_v31 = vrot.slane %v252_v2, %v271_v30  ;;  %v953_v32 = vrot.slane %v253_v3, %v271_v30  ;;  %vm441_vm0 = vcmp.lt.s32.totalorder %v967_v36, 111 }
  0x16   : > { %vm372_vm1 = vcmp.lt.s32.totalorder %v967_v36, 127  ;;  %vm416_vm2 = vcmp.lt.s32.totalorder %v967_v36, 112  ;;  %vm397_vm3 = vcmp.lt.s32.totalorder %v967_v36, 113  ;;  %vm329_vm5 = vcmp.lt.s32.totalorder %v967_v36, 1 }
  0x17   : > { %v364_v24 = vcombine.high %v362_v22, %v362_v22  ;;  %366 = vst [vmem:[#allocation2 + $0x48] sm:$0xf] %v362_v22  ;;  %370 = vrot.lane.b32.xlu1 %v258_v13, %s849_s9  ;;  %414 = vrot.lane.b32.xlu0 %v258_v13, %s848_s8  ;;  %vm285_vm6 = vcmp.lt.s32.totalorder %v967_v36, 16  ;;  %vm310_vm7 = vcmp.lt.s32.totalorder %v967_v36, 15  ;;  %vm266_vm8 = vcmp.lt.s32.totalorder %v967_v36, 17 }
  0x19   : > { %367 = vst [vmem:[#allocation2 + $0x28] sm:$0xf] %v364_v24 }
  0x1b   : > { %395 = vrot.lane.b32.xlu1 %v258_v13, %s850_s10  ;;  %393 = vrot.lane.b32.xlu0 %v256_v8, %s850_s10 }
  0x1f   : > { %327 = vrot.lane.b32.xlu1 %v258_v13, %s851_s11  ;;  %325 = vrot.lane.b32.xlu0 %v256_v8, %s851_s11 }
  0x23   : > { %283 = vrot.lane.b32.xlu1 %v258_v13, %s852_s12  ;;  %281 = vrot.lane.b32.xlu0 %v256_v8, %s852_s12 }
  0x27   : > { %308 = vrot.lane.b32.xlu1 %v258_v13, %s853_s13  ;;  %306 = vrot.lane.b32.xlu0 %v256_v8, %s853_s13 }
  0x2b   : > { %262 = vrot.lane.b32.xlu1 %v258_v13, %s855_s14  ;;  %260 = vrot.lane.b32.xlu0 %v256_v8, %s855_s14 }
  0x2f   : > { %470 = vperm.xlu0 %837, %v467_v35  }
  0x81   : > { %v438_v37 = vpop.permute.xlu1 %437  ;;  %v413_v38 = vpop.permute.xlu0 %412 }
  0x85   : > { %v369_v41 = vpop.permute.xlu0 %368  ;;  %v440_v42 = vpop.permute.xlu1 %439 }
  0x86   : > { %v442_v43 = vsel %vm441_vm0, %v438_v37, %v440_v42  ;;  %v443_v44 = vsel %vm441_vm0, %v440_v42, %v438_v37 }
  0x87   : > { %v452_v45 = vmul.f32 %v973_v39, %v442_v43  ;;  %v453_v46 = vmul.f32 %v978_v40, %v443_v44 }
  0x89   : > { %454 = vst [vmem:[#allocation2 + $0x40] sm:$0xf] %v452_v45  ;;  %455 = vst [vmem:[#allocation2 + $0x38] sm:$0xf] %v453_v46  ;;  %v371_v47 = vpop.permute.xlu1 %370  ;;  %v415_v48 = vpop.permute.xlu0 %414 }
  0x8a   : > { %v373_v49 = vsel %vm372_vm1, %v369_v41, %v371_v47  ;;  %v374_v50 = vsel %vm372_vm1, %v371_v47, %v369_v41  ;;  %v417_v51 = vsel %vm416_vm2, %v413_v38, %v415_v48  ;;  %v418_v52 = vsel %vm416_vm2, %v415_v48, %v413_v38 }
  0x8b   : > { %v383_v53 = vmul.f32 %v917_v11, %v373_v49  ;;  %v384_v54 = vmul.f32 %v919_v12, %v374_v50  ;;  %v427_v55 = vmul.f32 %v923_v14, %v417_v51  ;;  %v428_v56 = vmul.f32 %v925_v15, %v418_v52 }
  0x8d   : > { %v387_v57 = vrot.slane %v383_v53, 4  ;;  %v388_v58 = vrot.slane %v384_v54, 4  ;;  %v431_v59 = vrot.slane %v427_v55, 4  ;;  %v432_v60 = vrot.slane %v428_v56, 4  ;;  %v396_v61 = vpop.permute.xlu1 %395  ;;  %v394_v62 = vpop.permute.xlu0 %393 }
  0x8e   : > { %v398_v63 = vsel %vm397_vm3, %v394_v62, %v396_v61  ;;  %v399_v0 = vsel %vm397_vm3, %v396_v61, %v394_v62 }
  0x8f   : > { %391 = vst [vmem:[#allocation2 + $0x48] sm:$0xf0] %v387_v57  ;;  %392 = vst [vmem:[#allocation2 + $0x28] sm:$0xf0] %v388_v58  ;;  %v408_v1 = vmul.f32 %v927_v17, %v398_v63  ;;  %v409_v2 = vmul.f32 %v929_v18, %v399_v0 }
  0x90   : > { %435 = vst [vmem:[#allocation2 + $0x8] sm:$0xf0] %v431_v59  ;;  %436 = vst [vmem:[#allocation2 + $0x20] sm:$0xf0] %v432_v60  ;;  %v465_v3 = vld [vmem:[#allocation2 + $0x38] sm:$0xf] }
  0x91   : > { %v464_v4 = vld [vmem:[#allocation2 + $0x40] sm:$0xf]  ;;  %410 = vst [vmem:[#allocation2 + $0x8] sm:$0xf] %v408_v1  ;;  %411 = vst [vmem:[#allocation2 + $0x20] sm:$0xf] %v409_v2  ;;  %811 = vmatprep.subr.msk.mxu0 %vm477_vm4, %v465_v3  ;;  %v328_v5 = vpop.permute.xlu1 %327  ;;  %v326_v6 = vpop.permute.xlu0 %325 }
  0x92   : > { %v330_v7 = vsel %vm329_vm5, %v326_v6, %v328_v5  ;;  %v331_v8 = vsel %vm329_vm5, %v328_v5, %v326_v6  ;;  %812 = vmatpush1.msk.msra.mxu0 %vm477_vm4, %v464_v4  ;;  %v466_v60 = vld [vmem:[%s1121_s2] sm:$0xff] }
  0x93   : > { %v340_v13 = vmul.f32 %v933_v20, %v331_v8  ;;  %v341_v16 = vmul.f32 %v935_v21, %v330_v7  ;;  %v660_v4 = vld [vmem:[%s1124_s5] sm:$0xff] }
  0x95   : > { %v344_v19 = vrot.slane %v340_v13, 4  ;;  %v345_v22 = vrot.slane %v341_v16, 4  ;;  %v284_v23 = vpop.permute.xlu1 %283  ;;  %v282_v24 = vpop.permute.xlu0 %281 }
  0x96   : > { %v286_v27 = vsel %vm285_vm6, %v282_v24, %v284_v23  ;;  %v287_v30 = vsel %vm285_vm6, %v284_v23, %v282_v24  ;;  %v461_v46 = vld [vmem:[#allocation2 + $0x28] sm:$0xff] }
  0x97   : > { %348 = vst [vmem:[#allocation2 + $0x18] sm:$0xf0] %v344_v19  ;;  %349 = vst [vmem:[#allocation2 + $0x10] sm:$0xf0] %v345_v22  ;;  %v296_v33 = vmul.f32 %v939_v25, %v287_v30  ;;  %v297_v34 = vmul.f32 %v941_v26, %v286_v27  ;;  %v460_v49 = vld [vmem:[#allocation2 + $0x48] sm:$0xff] }
  0x98   : > { %v463_v35 = vld [vmem:[#allocation2 + $0x20] sm:$0xff]  ;;  %v462_v37 = vld [vmem:[#allocation2 + $0x8] sm:$0xff] }
  0x99   : > { %v300_v38 = vrot.slane %v296_v33, 4  ;;  %v301_v41 = vrot.slane %v297_v34, 4  ;;  %v309_v42 = vpop.permute.xlu1 %308  ;;  %508 = vmatprep.subr.mxu0 %v463_v35  ;;  %v307_v43 = vpop.permute.xlu0 %306 }
  0x9a   : > { %v311_v44 = vsel %vm310_vm7, %v307_v43, %v309_v42  ;;  %v312_v45 = vsel %vm310_vm7, %v309_v42, %v307_v43  ;;  %509 = vmatpush1.msra.mxu0 %v462_v37 }
  0x9b   : > { %304 = vst [vmem:[#allocation2 + $0x30] sm:$0xf0] %v300_v38  ;;  %305 = vst [vmem:[#allocation2] sm:$0xf0] %v301_v41  ;;  %v321_v47 = vmul.f32 %v945_v28, %v312_v45  ;;  %v322_v48 = vmul.f32 %v947_v29, %v311_v44  ;;  %510 = vmatprep.subr.mxu0 %v461_v46 }
  0x9c   : > { %511 = vmatpush1.msra.mxu0 %v460_v49 }
  0x9d   : > { %323 = vst [vmem:[#allocation2 + $0x18] sm:$0xf] %v321_v47  ;;  %324 = vst [vmem:[#allocation2 + $0x10] sm:$0xf] %v322_v48  ;;  %v263_v50 = vpop.permute.xlu1 %262  ;;  %v261_v51 = vpop.permute.xlu0 %260 }
  0x9e   : > { %v267_v52 = vsel %vm266_vm8, %v261_v51, %v263_v50  ;;  %v268_v53 = vsel %vm266_vm8, %v263_v50, %v261_v51 }
  0x9f   : > { %v277_v54 = vmul.f32 %v951_v31, %v268_v53  ;;  %v278_v55 = vmul.f32 %v953_v32, %v267_v52 }
  0xa1   : > { %279 = vst [vmem:[#allocation2 + $0x30] sm:$0xf] %v277_v54  ;;  %280 = vst [vmem:[#allocation2] sm:$0xf] %v278_v55 }
  0xa4   : > { %v459_v56 = vld [vmem:[#allocation2 + $0x10] sm:$0xff]  ;;  %v458_v57 = vld [vmem:[#allocation2 + $0x18] sm:$0xff] }
  0xa5   : > { %512 = vmatprep.subr.mxu0 %v459_v56 }
  0xa6   : > { %513 = vmatpush1.msra.mxu0 %v458_v57 }
  0xa8   : > { %v457_v58 = vld [vmem:[#allocation2] sm:$0xff]  ;;  %v456_v59 = vld [vmem:[#allocation2 + $0x30] sm:$0xff] }
  0xa9   : > { %514 = vmatprep.subr.mxu0 %v457_v58 }
  0xaa   : > { %515 = vmatpush1.msra.mxu0 %v456_v59  ;;  %v471_v61 = vpop.permute.xlu0 %470 }
  0xab   : > { %813 = vmatmul.mubr.msk.f32.vlgmr.msra.gmra.mxu0 %vm473_vm9, %v466_v60 }
 0x16b   : > { %v550_v62 = vpop.f32.mrf.mxu0 }
 0x16c   : > { %v551_v63 = vadd.f32 %v550_v62, %v471_v61 }
 0x16d   : > { %v552_v0 = vpop.f32.mrf.mxu0 }
 0x16e   : > { %v555_v1 = vmax.f32 %v551_v63, 0.0  ;;  %v553_v2 = vadd.f32 %v552_v0, %v471_v61 }
 0x170   : > { %621 = vrot.lane.b32.xlu0 %v555_v1, %s848_s8  ;;  %631 = vrot.lane.b32.xlu1 %v555_v1, %s847_s7  ;;  %v556_v3 = vmax.f32 %v553_v2, 0.0  ;;  %v597_v48 = vmul.f32 %v555_v1, %v913_v9 }
 0x174   : > { %611 = vrot.lane.b32.xlu0 %v555_v1, %s850_s10  ;;  %633 = vrot.lane.b32.xlu1 %v556_v3, %s847_s7 }
 0x178   : > { %601 = vrot.lane.b32.xlu0 %v555_v1, %s849_s9  ;;  %623 = vrot.lane.b32.xlu1 %v556_v3, %s848_s8  ;;  %s251_s8 = scalar_lea.vmem %s1125_s6, %s818_s29 }
 0x17c   : > { %587 = vrot.lane.b32.xlu0 %v555_v1, %s851_s11  ;;  %613 = vrot.lane.b32.xlu1 %v556_v3, %s850_s10 }
 0x180   : > { %577 = vrot.lane.b32.xlu0 %v555_v1, %s853_s13  ;;  %603 = vrot.lane.b32.xlu1 %v556_v3, %s849_s9 }
 0x184   : > { %567 = vrot.lane.b32.xlu0 %v555_v1, %s852_s12  ;;  %589 = vrot.lane.b32.xlu1 %v556_v3, %s851_s11 }
 0x188   : > { %557 = vrot.lane.b32.xlu0 %v555_v1, %s855_s14  ;;  %579 = vrot.lane.b32.xlu1 %v556_v3, %s853_s13 }
 0x18c   : > { %663 = vperm.xlu0 %837, %v660_v4   ;;  %569 = vrot.lane.b32.xlu1 %v556_v3, %s852_s12 }
 0x190   : > { %559 = vrot.lane.b32.xlu1 %v556_v3, %s855_s14 }
 0x1e2   : > { %v622_v5 = vpop.permute.xlu0 %621  ;;  %v632_v6 = vpop.permute.xlu1 %631 }
 0x1e6   : > { %v612_v7 = vpop.permute.xlu0 %611  ;;  %v634_v8 = vpop.permute.xlu1 %633 }
 0x1e7   : > { %v635_v13 = vsel %vm441_vm0, %v632_v6, %v634_v8  ;;  %v636_v16 = vsel %vm441_vm0, %v634_v8, %v632_v6 }
 0x1e8   : > { %v638_v19 = vmul.f32 %v978_v40, %v636_v16  ;;  %v637_v22 = vmul.f32 %v973_v39, %v635_v13 }
 0x1ea   : > { %v602_v23 = vpop.permute.xlu0 %601  ;;  %684 = vmatprep.subr.mxu1 %v638_v19  ;;  %v624_v24 = vpop.permute.xlu1 %623 }
 0x1eb   : > { %v625_v27 = vsel %vm416_vm2, %v622_v5, %v624_v24  ;;  %v626_v30 = vsel %vm416_vm2, %v624_v24, %v622_v5  ;;  %685 = vmatpush1.msra.mxu1 %v637_v22 }
 0x1ec   : > { %v627_v33 = vmul.f32 %v625_v27, %v923_v14  ;;  %v628_v34 = vmul.f32 %v626_v30, %v925_v15 }
 0x1ee   : > { %686 = vmatprep.subr.mxu1 %v628_v34  ;;  %v614_v35 = vpop.permute.xlu1 %613  ;;  %v588_v37 = vpop.permute.xlu0 %587 }
 0x1ef   : > { %v615_v40 = vsel %vm397_vm3, %v612_v7, %v614_v35  ;;  %v616_v39 = vsel %vm397_vm3, %v614_v35, %v612_v7  ;;  %687 = vmatpush1.msra.mxu1 %v627_v33 }
 0x1f0   : > { %v617_v38 = vmul.f32 %v615_v40, %v927_v17  ;;  %v618_v41 = vmul.f32 %v616_v39, %v929_v18  ;;  %v598_v17 = vmul.f32 %v556_v3, %v915_v10 }
 0x1f2   : > { %688 = vmatprep.subr.mxu1 %v618_v41  ;;  %v604_v42 = vpop.permute.xlu1 %603  ;;  %v578_v45 = vpop.permute.xlu0 %577 }
 0x1f3   : > { %v605_v14 = vsel %vm372_vm1, %v602_v23, %v604_v42  ;;  %v606_v15 = vsel %vm372_vm1, %v604_v42, %v602_v23  ;;  %689 = vmatpush1.msra.mxu1 %v617_v38 }
 0x1f4   : > { %v607_v43 = vmul.f32 %v605_v14, %v917_v11  ;;  %v608_v44 = vmul.f32 %v606_v15, %v919_v12 }
 0x1f6   : > { %690 = vmatprep.subr.mxu1 %v608_v44  ;;  %v590_v46 = vpop.permute.xlu1 %589  ;;  %v568_v51 = vpop.permute.xlu0 %567 }
 0x1f7   : > { %v591_v18 = vsel %vm329_vm5, %v588_v37, %v590_v46  ;;  %v592_v47 = vsel %vm329_vm5, %v590_v46, %v588_v37  ;;  %691 = vmatpush1.msra.mxu1 %v607_v43 }
 0x1f8   : > { %v593_v49 = vmul.f32 %v592_v47, %v933_v20  ;;  %v594_v11 = vmul.f32 %v591_v18, %v935_v21  ;;  %692 = vmatprep.subr.mxu1 %v598_v17 }
 0x1f9   : > { %693 = vmatpush1.msra.mxu1 %v597_v48 }
 0x1fa   : > { %v580_v12 = vpop.permute.xlu1 %579  ;;  %694 = vmatprep.subr.mxu1 %v594_v11  ;;  %v558_v56 = vpop.permute.xlu0 %557 }
 0x1fb   : > { %v581_v10 = vsel %vm310_vm7, %v578_v45, %v580_v12  ;;  %v582_v50 = vsel %vm310_vm7, %v580_v12, %v578_v45  ;;  %695 = vmatpush1.msra.mxu1 %v593_v49 }
 0x1fc   : > { %v583_v52 = vmul.f32 %v582_v50, %v945_v28  ;;  %v584_v9 = vmul.f32 %v581_v10, %v947_v29 }
 0x1fe   : > { %v570_v53 = vpop.permute.xlu1 %569  ;;  %696 = vmatprep.subr.mxu1 %v584_v9 }
 0x1ff   : > { %v571_v20 = vsel %vm285_vm6, %v568_v51, %v570_v53  ;;  %v572_v21 = vsel %vm285_vm6, %v570_v53, %v568_v51  ;;  %697 = vmatpush1.msra.mxu1 %v583_v52 }
 0x200   : > { %v573_v54 = vmul.f32 %v572_v21, %v939_v25  ;;  %v574_v55 = vmul.f32 %v571_v20, %v941_v26  ;;  %v659_v25 = vld [vmem:[%s1123_s4] sm:$0xff] }
 0x202   : > { %v560_v57 = vpop.permute.xlu1 %559  ;;  %698 = vmatprep.subr.mxu1 %v574_v55 }
 0x203   : > { %v561_v28 = vsel %vm266_vm8, %v558_v56, %v560_v57  ;;  %v562_v29 = vsel %vm266_vm8, %v560_v57, %v558_v56  ;;  %699 = vmatpush1.msra.mxu1 %v573_v54 }
 0x204   : > { %v563_v58 = vmul.f32 %v562_v29, %v951_v31  ;;  %v564_v59 = vmul.f32 %v561_v28, %v953_v32 }
 0x206   : > { %700 = vmatprep.subr.mxu1 %v564_v59 }
 0x207   : > { %701 = vmatpush1.msra.mxu1 %v563_v58  ;;  %v664_v26 = vpop.permute.xlu0 %663 }
 0x208   : > { %814 = vmatmul.mubr.msk.f32.vlgmr.msra.gmra.mxu1 %vm666_vm10, %v659_v25 }
 0x2c8   : > { %v736_v60 = vpop.f32.mrf.mxu1 }
 0x2c9   : > { %v737_v61 = vadd.f32 %v736_v60, %v664_v26 }
 0x2ca   : > { %v738_v36 = vpop.f32.mrf.mxu1 }
 0x2cb   : > { %v741_v31 = vmax.f32 %v737_v61, 0.0  ;;  %v739_v62 = vadd.f32 %v738_v36, %v664_v26 }
 0x2cd   : > { %743 = vst [vmem:[%s251_s8] sm:$0xff] %v741_v31  ;;  %v742_v32 = vmax.f32 %v739_v62, 0.0 }
 0x2cf   : > { %744 = vst [vmem:[%s251_s8 + $0x8] sm:$0xff] %v742_v32 }
 0x2d0 PF: > { %s16_s21 = sadd.s32 1, %s845_s21  }
 0x2d1   : > { %p13_p4 = scmp.ge.s32.totalorder %s16_s21, 4  }
 0x2d3   :  { %15 = sbr.rel (!%p13_p4) target bundleno = 1 (0x1), region = 74 }

</bundles_post_ra>
